<compile_context>
chip_gen: v5e
topology: v5e:2x2
jax: 0.10.0
libtpu: 0.0.40
codegen_flags: <defaults>
</compile_context>

<pallas_src>
import functools

import jax
import jax.numpy as jnp
from jax import lax
from jax.experimental import pallas as pl
from jax.experimental.pallas import tpu as pltpu

_LANE = 128
_SUBLANE = 8


def _cae_loss_kernel(x_ref, xh_ref, zin_ref, tgt_ref, zout_ref, c_ref,
                     out_ref, acc_ref, *,
                     inv_n, d_in, d_out, lambda_tc, lambda_out, lambda_cent,
                     mask_axis, tile_len, valid_len, use_small_tail):
    p = pl.program_id(0)          # parallel split (megacore / dual-TC friendly)
    k = pl.program_id(1)          # reduction over streamed tiles
    nk = pl.num_programs(1)

    # ---------- tiled reconstruction SSE (dominant, HBM-bound) ----------
    @pl.when(k == 0)
    def _init():
        acc_ref[...] = jnp.zeros_like(acc_ref)

    diff = x_ref[...].astype(jnp.float32) - xh_ref[...].astype(jnp.float32)
    d2 = diff * diff
    if mask_axis is not None:
        # Ragged last tile: mask out-of-range positions (select -> garbage in
        # the padded region of a partial block cannot pollute the sum).
        start = (p * nk + k) * tile_len
        idx = lax.broadcasted_iota(jnp.int32, d2.shape, mask_axis)
        d2 = jnp.where(start + idx < valid_len, d2, 0.0)
    acc_ref[...] += d2            # pure VPU; no per-step cross-lane reduce

    # ---------- per-split partial MSE, written once at the last step ----------
    @pl.when(k == nk - 1)
    def _write_partial():
        out_ref[...] = (jnp.zeros(out_ref.shape, jnp.float32)
                        + jnp.sum(acc_ref[...]) * jnp.float32(inv_n))

    # ---------- tiny tail terms: only once (split 0, last step) ----------
    @pl.when(jnp.logical_and(k == nk - 1, p == 0))
    def _finalize():
        # normalize centers (mirrors the in-place no_grad normalization)
        c = c_ref[...].astype(jnp.float32)                               # (K, L)
        c = c * lax.rsqrt(jnp.sum(c * c, axis=-1, keepdims=True))

        zin = zin_ref[...].astype(jnp.float32)                           # (B, L)
        B, L = zin.shape
        K = c.shape[0]

        # triplet-center loss
        if use_small_tail:
            # Direct-difference distances on the VPU (exact, no MXU padding);
            # only used when the (B, K, L) temp is a few hundred KiB at most.
            dvec = zin[:, None, :] - c[None, :, :]                       # (B, K, L)
            dist = jnp.sqrt(jnp.sum(dvec * dvec, axis=-1))               # (B, K)
        else:
            # Expanded form on the MXU; |c| == 1 after normalization.
            zin_sq = jnp.sum(zin * zin, axis=-1, keepdims=True)          # (B, 1)
            cross = lax.dot_general(zin, c, (((1,), (1,)), ((), ())),
                                    preferred_element_type=jnp.float32)  # (B, K)
            dist = jnp.sqrt(jnp.maximum(zin_sq - 2.0 * cross + 1.0, 0.0))

        onehot = (lax.broadcasted_iota(jnp.int32, (B, K), 1)
                  == tgt_ref[...])                                       # (B, K)
        pos = jnp.sum(jnp.where(onehot, dist, 0.0), axis=-1, keepdims=True)
        neg = jnp.min(jnp.where(onehot, jnp.float32(1e30), dist),
                      axis=-1, keepdims=True)
        loss_tc = jnp.mean(jnp.maximum(pos + d_in - neg, 0.0))

        # outlier loss
        zo = zout_ref[...].astype(jnp.float32)                           # (B, L)
        zo_norm = jnp.sqrt(jnp.sum(zo * zo, axis=-1, keepdims=True))     # (B, 1)
        loss_outlier = jnp.mean(jnp.maximum(d_out - zo_norm, 0.0))

        # centroid orthogonality loss: || C C^T - I ||_F
        if use_small_tail:
            gram = jnp.sum(c[:, None, :] * c[None, :, :], axis=-1)       # (K, K)
        else:
            gram = lax.dot_general(c, c, (((1,), (1,)), ((), ())),
                                   preferred_element_type=jnp.float32)
        eye = (lax.broadcasted_iota(jnp.int32, (K, K), 0)
               == lax.broadcasted_iota(jnp.int32, (K, K), 1)).astype(jnp.float32)
        g = gram - eye
        loss_ortho = jnp.sqrt(jnp.sum(g * g))

        tail = (lambda_tc * loss_tc + lambda_out * loss_outlier
                + lambda_cent * loss_ortho)
        out_ref[...] = out_ref[...] + tail


def _round_up(a, b):
    return (a + b - 1) // b * b


def _device_defaults():
    """(max_tile_bytes per input buffer, num_splits) by TPU generation."""
    kind = ""
    try:
        kind = jax.devices()[0].device_kind.lower()
    except Exception:
        pass
    if "v7" in kind:                       # 2 TCs, 64 MiB VMEM/TC, 3.2 TB/s
        return 4 << 20, 2
    if "v6" in kind:                       # 1 TC, 128 MiB VMEM
        return 6 << 20, 1
    if "v4" in kind or "v5p" in kind:      # megacore (2 fused TCs)
        return 4 << 20, 2
    return 2 << 20, 1                      # v5e / unknown: conservative


def cae_loss(x, x_hat, target, z_in, z_out, centers, *,
             d_in=0.1, d_out=1.0, lambda_tc=1.0, lambda_out=1.0,
             lambda_cent=1.0, max_tile_bytes=None, num_splits=None,
             small_tail_max_bytes=256 * 1024):
    """Pallas implementation of CAELoss.forward."""
    dev_tile, dev_splits = _device_defaults()
    if max_tile_bytes is None:
        max_tile_bytes = dev_tile
    if num_splits is None:
        num_splits = dev_splits
    max_tile_bytes = min(int(max_tile_bytes), 8 << 20)

    B = x.shape[0]
    D = x.size // B
    N = B * D
    itemsize = jnp.dtype(x.dtype).itemsize

    if z_out is None:
        z_out = jnp.zeros_like(z_in)       # contributes 0 with lambda_out = 0
        lambda_out = 0.0

    # ---- choose a lane-dense 2-D view of the N elements (no HBM pad) ----
    cols = None
    for c in (512, 256, 128):
        if N % c == 0 and (N // c) % _SUBLANE == 0:
            cols = c
            break
    if cols is None:
        for c in (512, 256, 128):
            if N % c == 0:
                cols = c
                break

    if cols is not None:
        # Sublane/lane-dense slab (R, COLS); tile over rows.
        rows = N // cols
        x2 = x.reshape(rows, cols)
        xh2 = x_hat.reshape(rows, cols)
        max_rows = max(_SUBLANE,
                       (max_tile_bytes // (cols * itemsize)) // _SUBLANE * _SUBLANE)
        if max_rows >= rows:
            block, num_tiles, tiled_axis = (rows, cols), 1, None
            tile_len, valid_len = rows, rows
        else:
            block, num_tiles, tiled_axis = (max_rows, cols), -(-rows // max_rows), 0
            tile_len, valid_len = max_rows, rows
    else:
        # Fallback: N not a multiple of 128 -> (B, D) view, tile over columns.
        x2 = x.reshape(B, D)
        xh2 = x_hat.reshape(B, D)
        max_cols = max(_LANE,
                       (max_tile_bytes // max(1, B * itemsize)) // _LANE * _LANE)
        if max_cols >= D:
            block, num_tiles, tiled_axis = (B, D), 1, None
            tile_len, valid_len = D, D
        else:
            block, num_tiles, tiled_axis = (B, max_cols), -(-D // max_cols), 1
            tile_len, valid_len = max_cols, D

    # Ragged last tile? Mask in-kernel; otherwise keep the hot loop mask-free.
    mask_axis = None
    if tiled_axis is not None and valid_len % tile_len != 0:
        mask_axis = tiled_axis

    # ---- parallel splits: only if P divides the tile count (no waste) ----
    P = max(1, int(num_splits))
    while P > 1 and (num_tiles % P != 0 or num_tiles < 2 * P):
        P -= 1
    tiles_per_split = num_tiles // P

    if tiled_axis == 0:
        index_map = lambda p, k, t=tiles_per_split: (p * t + k, 0)
    elif tiled_axis == 1:
        index_map = lambda p, k, t=tiles_per_split: (0, p * t + k)
    else:
        index_map = lambda p, k: (0, 0)
    full = lambda p, k: (0, 0)             # small operands stay resident

    tgt = target.astype(jnp.int32).reshape(B, 1)
    K, L = centers.shape
    use_small_tail = (K <= 128) and (B * K * L * 4 <= small_tail_max_bytes)

    kernel = functools.partial(
        _cae_loss_kernel,
        inv_n=1.0 / float(N),
        d_in=float(d_in), d_out=float(d_out),
        lambda_tc=float(lambda_tc), lambda_out=float(lambda_out),
        lambda_cent=float(lambda_cent),
        mask_axis=mask_axis, tile_len=int(tile_len), valid_len=int(valid_len),
        use_small_tail=bool(use_small_tail))

    # ---- VMEM budget derived from the real (padded) buffer footprint ----
    pad_r = _round_up(block[0], _SUBLANE)
    pad_c = _round_up(block[1], _LANE)
    tile_bytes = pad_r * pad_c * itemsize
    acc_bytes = pad_r * pad_c * 4
    resident = sum(_round_up(a.shape[0], _SUBLANE)
                   * _round_up(a.shape[-1], _LANE)
                   * jnp.dtype(a.dtype).itemsize
                   for a in (z_in, z_out, centers)) * 2
    resident += _round_up(B, _SUBLANE) * _LANE * 4 * 2          # tgt
    if use_small_tail:
        tail_bytes = 4 * (B * K * L + 4 * B * K + 2 * K * K) * 4
    else:
        tail_bytes = 4 * (4 * B * K + 2 * K * K) * 4
    vmem_limit = (2 * 2 * tile_bytes + acc_bytes + resident + tail_bytes
                  + P * _SUBLANE * _LANE * 4 * 2 + (4 << 20))
    vmem_limit = int(min(max(vmem_limit, 16 << 20), 56 << 20))

    cost = pl.CostEstimate(
        flops=int(3 * N + 8 * B * K * L + 2 * K * K * L),
        transcendentals=int(B * K + B + K + 8),
        bytes_accessed=int(2 * N * itemsize
                           + (z_in.size + z_out.size + centers.size) * 4
                           + B * 4 + P * _SUBLANE * _LANE * 4))

    out = pl.pallas_call(
        kernel,
        out_shape=jax.ShapeDtypeStruct((P * _SUBLANE, _LANE), jnp.float32),
        grid=(P, tiles_per_split),
        in_specs=[
            pl.BlockSpec(block, index_map),         # x   (streamed, native dtype)
            pl.BlockSpec(block, index_map),         # x_hat
            pl.BlockSpec((B, L), full),             # z_in
            pl.BlockSpec((B, 1), full),             # target (int32 column)
            pl.BlockSpec((B, L), full),             # z_out
            pl.BlockSpec((K, L), full),             # centers
        ],
        out_specs=pl.BlockSpec((_SUBLANE, _LANE), lambda p, k: (p, 0)),
        scratch_shapes=[pltpu.VMEM(block, jnp.float32)],   # f32 tile accumulator
        compiler_params=pltpu.CompilerParams(
            dimension_semantics=("parallel", "arbitrary"),
            vmem_limit_bytes=vmem_limit),
        cost_estimate=cost,
    )(x2, xh2, z_in, tgt, z_out, centers)

    # Each split's (8,128) output block is uniformly filled with its partial
    # loss (split 0 additionally carries the tail terms); sum the partials.
    return jnp.sum(out[::_SUBLANE, 0])


def cae_loss_ref(x, x_hat, target, z_in, z_out, centers, *,
                 d_in=0.1, d_out=1.0, lambda_tc=1.0, lambda_out=1.0,
                 lambda_cent=1.0):
    """Pure-JAX reference mirroring the PyTorch semantics."""
    c = centers / jnp.linalg.norm(centers, axis=-1, keepdims=True)
    mse = jnp.mean((x.astype(jnp.float32) - x_hat.astype(jnp.float32)) ** 2)
    dist = jnp.linalg.norm(z_in[:, None, :] - c[None, :, :], axis=-1)     # (B, K)
    K = centers.shape[0]
    onehot = jax.nn.one_hot(target, K, dtype=jnp.float32) > 0
    pos = jnp.sum(jnp.where(onehot, dist, 0.0), axis=-1)
    neg = jnp.min(jnp.where(onehot, jnp.inf, dist), axis=-1)
    tc = jnp.mean(jnp.maximum(pos + d_in - neg, 0.0))
    outl = jnp.mean(jnp.maximum(d_out - jnp.linalg.norm(z_out, axis=-1), 0.0))
    gram = c @ c.T
    ortho = jnp.linalg.norm(gram - jnp.eye(K))
    return mse + lambda_tc * tc + lambda_out * outl + lambda_cent * ortho


if __name__ == "__main__":
    num_classes, num_latent = 4, 32
    root = jax.random.PRNGKey(0)

    def run_case(shape, **kw):
        ks = jax.random.split(jax.random.fold_in(root, int(sum(shape))), 6)
        B = shape[0]
        x = jax.random.normal(ks[0], shape, dtype=jnp.float32)
        x_hat = jax.random.normal(ks[1], shape, dtype=jnp.float32)
        z_in = jax.random.normal(ks[2], (B, num_latent), dtype=jnp.float32)
        z_out = jax.random.normal(ks[3], (B, num_latent), dtype=jnp.float32)
        centers = jax.random.normal(ks[4], (num_classes, num_latent),
                                    dtype=jnp.float32)
        target = jax.random.randint(ks[5], (B,), 0, num_classes, dtype=jnp.int32)
        got = jax.block_until_ready(
            cae_loss(x, x_hat, target, z_in, z_out, centers, **kw))
        want = cae_loss_ref(x, x_hat, target, z_in, z_out, centers)
        assert jnp.allclose(got, want, rtol=1e-3, atol=1e-3), (shape, kw, got, want)

    # 1) lane-dense slab, single tile, auto (per-generation) defaults.
    run_case((2, 4, 16, 16))
    # 2) multi-tile pipeline + 2 parallel splits + ragged row-block masking.
    run_case((4, 3, 40, 40), max_tile_bytes=8192, num_splits=2)
    # 3) fallback (B, D) path with ragged column masking (N not a mult. of 128).
    run_case((2, 3, 15, 15), max_tile_bytes=1024, num_splits=2)
    # 4) MXU expanded-distance tail branch.
    run_case((2, 4, 16, 16), small_tail_max_bytes=0)

    print("KERNEL_OK")
</pallas_src>

<mosaic_0001>
module attributes {stable_mosaic.version = 11 : i64} {
  func.func @_cae_loss_kernel(%arg0: i32, %arg1: i32, %arg2: memref<8x256xf32, #tpu.memory_space<vmem>>, %arg3: memref<8x256xf32, #tpu.memory_space<vmem>>, %arg4: memref<2x32xf32, #tpu.memory_space<vmem>>, %arg5: memref<2x1xi32, #tpu.memory_space<vmem>>, %arg6: memref<2x32xf32, #tpu.memory_space<vmem>>, %arg7: memref<4x32xf32, #tpu.memory_space<vmem>>, %arg8: memref<8x128xf32, #tpu.memory_space<vmem>>, %arg9: memref<8x256xf32, #tpu.memory_space<vmem>>) attributes {dimension_semantics = [#tpu.dimension_semantics<parallel>, #tpu.dimension_semantics<arbitrary>], iteration_bounds = array<i64: 1, 1>, scalar_prefetch = 0 : i64, scratch_operands = 1 : i64, tpu.core_type = #tpu.core_type<tc>, window_params = [{pipeline_mode = #tpu.pipeline_mode<synchronous>, transform_indices = @transform_0, window_bounds = array<i64: 8, 256>}, {pipeline_mode = #tpu.pipeline_mode<synchronous>, transform_indices = @transform_1, window_bounds = array<i64: 8, 256>}, {pipeline_mode = #tpu.pipeline_mode<synchronous>, transform_indices = @transform_2, window_bounds = array<i64: 2, 32>}, {pipeline_mode = #tpu.pipeline_mode<synchronous>, transform_indices = @transform_3, window_bounds = array<i64: 2, 1>}, {pipeline_mode = #tpu.pipeline_mode<synchronous>, transform_indices = @transform_4, window_bounds = array<i64: 2, 32>}, {pipeline_mode = #tpu.pipeline_mode<synchronous>, transform_indices = @transform_5, window_bounds = array<i64: 4, 32>}, {transform_indices = @transform_6, window_bounds = array<i64: 8, 128>}]} {
    %c0_i32 = arith.constant 0 : i32
    %0 = arith.cmpi eq, %arg1, %c0_i32 : i32
    %1 = arith.extui %0 : i1 to i32
    %c0_i32_0 = arith.constant 0 : i32
    %2 = arith.cmpi ne, %1, %c0_i32_0 : i32
    scf.if %2 {
      %cst = arith.constant 0.000000e+00 : f32
      %18 = vector.broadcast %cst : f32 to vector<8x256xf32>
      %c0_13 = arith.constant 0 : index
      %c0_14 = arith.constant 0 : index
      %19 = vector.load %arg9[%c0_13, %c0_14] : memref<8x256xf32, #tpu.memory_space<vmem>>, vector<8x256xf32>
      tpu.vector_store %arg9[%c0_13, %c0_14], %18 {strides = array<i32>} : memref<8x256xf32, #tpu.memory_space<vmem>>, vector<8x256xf32>,
    } else {
    }
    %c0 = arith.constant 0 : index
    %c0_1 = arith.constant 0 : index
    %3 = vector.load %arg2[%c0, %c0_1] : memref<8x256xf32, #tpu.memory_space<vmem>>, vector<8x256xf32>
    %c0_2 = arith.constant 0 : index
    %c0_3 = arith.constant 0 : index
    %4 = vector.load %arg3[%c0_2, %c0_3] : memref<8x256xf32, #tpu.memory_space<vmem>>, vector<8x256xf32>
    %5 = arith.subf %3, %4 : vector<8x256xf32>
    %6 = arith.mulf %5, %5 : vector<8x256xf32>
    %c0_4 = arith.constant 0 : index
    %c0_5 = arith.constant 0 : index
    %7 = vector.load %arg9[%c0_4, %c0_5] : memref<8x256xf32, #tpu.memory_space<vmem>>, vector<8x256xf32>
    %8 = arith.addf %7, %6 : vector<8x256xf32>
    %c0_6 = arith.constant 0 : index
    %c0_7 = arith.constant 0 : index
    %9 = vector.load %arg9[%c0_6, %c0_7] : memref<8x256xf32, #tpu.memory_space<vmem>>, vector<8x256xf32>
    tpu.vector_store %arg9[%c0_6, %c0_7], %8 {strides = array<i32>} : memref<8x256xf32, #tpu.memory_space<vmem>>, vector<8x256xf32>,
    %c0_i32_8 = arith.constant 0 : i32
    %10 = arith.cmpi eq, %arg1, %c0_i32_8 : i32
    %11 = arith.extui %10 : i1 to i32
    %c0_i32_9 = arith.constant 0 : i32
    %12 = arith.cmpi ne, %11, %c0_i32_9 : i32
    scf.if %12 {
      %cst = arith.constant 0.000000e+00 : f32
      %18 = vector.broadcast %cst : f32 to vector<8x128xf32>
      %c0_13 = arith.constant 0 : index
      %c0_14 = arith.constant 0 : index
      %19 = vector.load %arg9[%c0_13, %c0_14] : memref<8x256xf32, #tpu.memory_space<vmem>>, vector<8x256xf32>
      %20 = vector.shape_cast %19 : vector<8x256xf32> to vector<1x8x256xf32>
      %cst_15 = arith.constant dense<0.000000e+00> : vector<1xf32>
      %21 = vector.multi_reduction <add>, %20, %cst_15 [1, 2] : vector<1x8x256xf32> to vector<1xf32>
      %22 = vector.shape_cast %21 : vector<1xf32> to vector<1x1x1xf32>
      %23 = vector.extract %22[0, 0, 0] : f32 from vector<1x1x1xf32>
      %cst_16 = arith.constant 4.8828125E-4 : f32
      %24 = arith.mulf %23, %cst_16 : f32
      %25 = vector.broadcast %24 : f32 to vector<8x128xf32>
      %26 = arith.addf %18, %25 : vector<8x128xf32>
      %c0_17 = arith.constant 0 : index
      %c0_18 = arith.constant 0 : index
      %27 = vector.load %arg8[%c0_17, %c0_18] : memref<8x128xf32, #tpu.memory_space<vmem>>, vector<8x128xf32>
      tpu.vector_store %arg8[%c0_17, %c0_18], %26 {strides = array<i32>} : memref<8x128xf32, #tpu.memory_space<vmem>>, vector<8x128xf32>,
    } else {
    }
    %c0_i32_10 = arith.constant 0 : i32
    %13 = arith.cmpi eq, %arg1, %c0_i32_10 : i32
    %c0_i32_11 = arith.constant 0 : i32
    %14 = arith.cmpi eq, %arg0, %c0_i32_11 : i32
    %15 = arith.andi %13, %14 : i1
    %16 = arith.extui %15 : i1 to i32
    %c0_i32_12 = arith.constant 0 : i32
    %17 = arith.cmpi ne, %16, %c0_i32_12 : i32
    scf.if %17 {
      %c0_13 = arith.constant 0 : index
      %c0_14 = arith.constant 0 : index
      %18 = vector.load %arg7[%c0_13, %c0_14] : memref<4x32xf32, #tpu.memory_space<vmem>>, vector<4x32xf32>
      %19 = arith.mulf %18, %18 : vector<4x32xf32>
      %cst = arith.constant dense<0.000000e+00> : vector<4xf32>
      %20 = vector.multi_reduction <add>, %19, %cst [1] : vector<4x32xf32> to vector<4xf32>
      %21 = vector.shape_cast %20 : vector<4xf32> to vector<4x1xf32>
      %22 = math.rsqrt %21 : vector<4x1xf32>
      %23 = vector.broadcast %22 : vector<4x1xf32> to vector<4x32xf32>
      %24 = arith.mulf %18, %23 : vector<4x32xf32>
      %c0_15 = arith.constant 0 : index
      %c0_16 = arith.constant 0 : index
      %25 = vector.load %arg4[%c0_15, %c0_16] : memref<2x32xf32, #tpu.memory_space<vmem>>, vector<2x32xf32>
      %26 = vector.shape_cast %25 : vector<2x32xf32> to vector<2x1x32xf32>
      %27 = vector.shape_cast %24 : vector<4x32xf32> to vector<1x4x32xf32>
      %28 = vector.broadcast %26 : vector<2x1x32xf32> to vector<2x4x32xf32>
      %29 = vector.broadcast %27 : vector<1x4x32xf32> to vector<2x4x32xf32>
      %30 = arith.subf %28, %29 : vector<2x4x32xf32>
      %31 = arith.mulf %30, %30 : vector<2x4x32xf32>
      %cst_17 = arith.constant dense<0.000000e+00> : vector<2x4xf32>
      %32 = vector.multi_reduction <add>, %31, %cst_17 [2] : vector<2x4x32xf32> to vector<2x4xf32>
      %33 = math.sqrt %32 : vector<2x4xf32>
      %34 = tpu.iota {dimensions = array<i32: 1>} : vector<2x4xi32>
      %c0_18 = arith.constant 0 : index
      %c0_19 = arith.constant 0 : index
      %35 = vector.load %arg5[%c0_18, %c0_19] : memref<2x1xi32, #tpu.memory_space<vmem>>, vector<2x1xi32>
      %36 = vector.broadcast %35 : vector<2x1xi32> to vector<2x4xi32>
      %37 = arith.cmpi eq, %34, %36 : vector<2x4xi32>
      %cst_20 = arith.constant 0.000000e+00 : f32
      %38 = vector.broadcast %cst_20 : f32 to vector<2x4xf32>
      %39 = arith.select %37, %33, %38 : vector<2x4xi1>, vector<2x4xf32>
      %cst_21 = arith.constant dense<0.000000e+00> : vector<2xf32>
      %40 = vector.multi_reduction <add>, %39, %cst_21 [1] : vector<2x4xf32> to vector<2xf32>
      %41 = vector.shape_cast %40 : vector<2xf32> to vector<2x1xf32>
      %cst_22 = arith.constant 1.000000e+30 : f32
      %42 = vector.broadcast %cst_22 : f32 to vector<2x4xf32>
      %43 = arith.select %37, %42, %33 : vector<2x4xi1>, vector<2x4xf32>
      %cst_23 = arith.constant dense<0x7F800000> : vector<2xf32>
      %44 = vector.multi_reduction <minimumf>, %43, %cst_23 [1] : vector<2x4xf32> to vector<2xf32>
      %45 = vector.shape_cast %44 : vector<2xf32> to vector<2x1xf32>
      %cst_24 = arith.constant 1.000000e-01 : f32
      %46 = vector.broadcast %cst_24 : f32 to vector<2x1xf32>
      %47 = arith.addf %41, %46 : vector<2x1xf32>
      %48 = arith.subf %47, %45 : vector<2x1xf32>
      %cst_25 = arith.constant 0.000000e+00 : f32
      %49 = vector.broadcast %cst_25 : f32 to vector<2x1xf32>
      %50 = arith.maximumf %48, %49 : vector<2x1xf32>
      %51 = vector.shape_cast %50 : vector<2x1xf32> to vector<1x2x1xf32>
      %cst_26 = arith.constant dense<0.000000e+00> : vector<1xf32>
      %52 = vector.multi_reduction <add>, %51, %cst_26 [1, 2] : vector<1x2x1xf32> to vector<1xf32>
      %53 = vector.shape_cast %52 : vector<1xf32> to vector<1x1x1xf32>
      %54 = vector.extract %53[0, 0, 0] : f32 from vector<1x1x1xf32>
      %cst_27 = arith.constant 2.000000e+00 : f32
      %55 = arith.divf %54, %cst_27 : f32
      %c0_28 = arith.constant 0 : index
      %c0_29 = arith.constant 0 : index
      %56 = vector.load %arg6[%c0_28, %c0_29] : memref<2x32xf32, #tpu.memory_space<vmem>>, vector<2x32xf32>
      %57 = arith.mulf %56, %56 : vector<2x32xf32>
      %cst_30 = arith.constant dense<0.000000e+00> : vector<2xf32>
      %58 = vector.multi_reduction <add>, %57, %cst_30 [1] : vector<2x32xf32> to vector<2xf32>
      %59 = vector.shape_cast %58 : vector<2xf32> to vector<2x1xf32>
      %60 = math.sqrt %59 : vector<2x1xf32>
      %cst_31 = arith.constant 1.000000e+00 : f32
      %61 = vector.broadcast %cst_31 : f32 to vector<2x1xf32>
      %62 = arith.subf %61, %60 : vector<2x1xf32>
      %cst_32 = arith.constant 0.000000e+00 : f32
      %63 = vector.broadcast %cst_32 : f32 to vector<2x1xf32>
      %64 = arith.maximumf %62, %63 : vector<2x1xf32>
      %65 = vector.shape_cast %64 : vector<2x1xf32> to vector<1x2x1xf32>
      %cst_33 = arith.constant dense<0.000000e+00> : vector<1xf32>
      %66 = vector.multi_reduction <add>, %65, %cst_33 [1, 2] : vector<1x2x1xf32> to vector<1xf32>
      %67 = vector.shape_cast %66 : vector<1xf32> to vector<1x1x1xf32>
      %68 = vector.extract %67[0, 0, 0] : f32 from vector<1x1x1xf32>
      %cst_34 = arith.constant 2.000000e+00 : f32
      %69 = arith.divf %68, %cst_34 : f32
      %70 = vector.shape_cast %24 : vector<4x32xf32> to vector<4x1x32xf32>
      %71 = vector.shape_cast %24 : vector<4x32xf32> to vector<1x4x32xf32>
      %72 = vector.broadcast %70 : vector<4x1x32xf32> to vector<4x4x32xf32>
      %73 = vector.broadcast %71 : vector<1x4x32xf32> to vector<4x4x32xf32>
      %74 = arith.mulf %72, %73 : vector<4x4x32xf32>
      %cst_35 = arith.constant dense<0.000000e+00> : vector<4x4xf32>
      %75 = vector.multi_reduction <add>, %74, %cst_35 [2] : vector<4x4x32xf32> to vector<4x4xf32>
      %76 = tpu.iota {dimensions = array<i32: 0>} : vector<4x4xi32>
      %77 = tpu.iota {dimensions = array<i32: 1>} : vector<4x4xi32>
      %78 = arith.cmpi eq, %76, %77 : vector<4x4xi32>
      %79 = arith.extui %78 : vector<4x4xi1> to vector<4x4xi32>
      %80 = arith.sitofp %79 : vector<4x4xi32> to vector<4x4xf32>
      %81 = arith.subf %75, %80 : vector<4x4xf32>
      %82 = arith.mulf %81, %81 : vector<4x4xf32>
      %83 = vector.shape_cast %82 : vector<4x4xf32> to vector<1x4x4xf32>
      %cst_36 = arith.constant dense<0.000000e+00> : vector<1xf32>
      %84 = vector.multi_reduction <add>, %83, %cst_36 [1, 2] : vector<1x4x4xf32> to vector<1xf32>
      %85 = vector.shape_cast %84 : vector<1xf32> to vector<1x1x1xf32>
      %86 = vector.extract %85[0, 0, 0] : f32 from vector<1x1x1xf32>
      %87 = math.sqrt %86 : f32
      %cst_37 = arith.constant 1.000000e+00 : f32
      %88 = arith.mulf %cst_37, %55 : f32
      %cst_38 = arith.constant 1.000000e+00 : f32
      %89 = arith.mulf %cst_38, %69 : f32
      %90 = arith.addf %88, %89 : f32
      %cst_39 = arith.constant 1.000000e+00 : f32
      %91 = arith.mulf %cst_39, %87 : f32
      %92 = arith.addf %90, %91 : f32
      %c0_40 = arith.constant 0 : index
      %c0_41 = arith.constant 0 : index
      %93 = vector.load %arg8[%c0_40, %c0_41] : memref<8x128xf32, #tpu.memory_space<vmem>>, vector<8x128xf32>
      %94 = vector.broadcast %92 : f32 to vector<8x128xf32>
      %95 = arith.addf %93, %94 : vector<8x128xf32>
      %c0_42 = arith.constant 0 : index
      %c0_43 = arith.constant 0 : index
      %96 = vector.load %arg8[%c0_42, %c0_43] : memref<8x128xf32, #tpu.memory_space<vmem>>, vector<8x128xf32>
      tpu.vector_store %arg8[%c0_42, %c0_43], %95 {strides = array<i32>} : memref<8x128xf32, #tpu.memory_space<vmem>>, vector<8x128xf32>,
    } else {
    }
    return
  }
  func.func @transform_0(%arg0: i32, %arg1: i32) -> (i32, i32) {
    %c0_i32 = arith.constant 0 : i32
    %c0_i32_0 = arith.constant 0 : i32
    %c0_i32_1 = arith.constant 0 : i32
    return %c0_i32, %c0_i32_0 : i32, i32
  }
  func.func @transform_1(%arg0: i32, %arg1: i32) -> (i32, i32) {
    %c0_i32 = arith.constant 0 : i32
    %c0_i32_0 = arith.constant 0 : i32
    %c0_i32_1 = arith.constant 0 : i32
    return %c0_i32, %c0_i32_0 : i32, i32
  }
  func.func @transform_2(%arg0: i32, %arg1: i32) -> (i32, i32) {
    %c0_i32 = arith.constant 0 : i32
    %c0_i32_0 = arith.constant 0 : i32
    %c0_i32_1 = arith.constant 0 : i32
    return %c0_i32, %c0_i32_0 : i32, i32
  }
  func.func @transform_3(%arg0: i32, %arg1: i32) -> (i32, i32) {
    %c0_i32 = arith.constant 0 : i32
    %c0_i32_0 = arith.constant 0 : i32
    %c0_i32_1 = arith.constant 0 : i32
    return %c0_i32, %c0_i32_0 : i32, i32
  }
  func.func @transform_4(%arg0: i32, %arg1: i32) -> (i32, i32) {
    %c0_i32 = arith.constant 0 : i32
    %c0_i32_0 = arith.constant 0 : i32
    %c0_i32_1 = arith.constant 0 : i32
    return %c0_i32, %c0_i32_0 : i32, i32
  }
  func.func @transform_5(%arg0: i32, %arg1: i32) -> (i32, i32) {
    %c0_i32 = arith.constant 0 : i32
    %c0_i32_0 = arith.constant 0 : i32
    %c0_i32_1 = arith.constant 0 : i32
    return %c0_i32, %c0_i32_0 : i32, i32
  }
  func.func @transform_6(%arg0: i32, %arg1: i32) -> (i32, i32) {
    %c0_i32 = arith.constant 0 : i32
    %c0_i32_0 = arith.constant 0 : i32
    return %arg0, %c0_i32 : i32, i32
  }
}

</mosaic_0001>

<bundles_post_ra>
// kernel: tpu_custom_call.1
= control target key start
LH: loop header
LB: loop body
LE: loop exit
PB: predicated region body
PF: predicated region fallthrough
CT: control target
= control target key end

     0   :  { %11 = vsyncpa [#allocation4], 0  ;;  %s637_s0 = inlined_call_operand.hbm [shape: f32[8,256], index: 0, kind: input, shape index: {}]   ;;  %s638_s1 = inlined_call_operand.hbm [shape: f32[8,256], index: 1, kind: input, shape index: {}]   ;;  %s639_s2 = inlined_call_operand.vmem [shape: f32[2,32], index: 2, kind: input, shape index: {}]   ;;  %s640_s3 = inlined_call_operand.vmem [shape: s32[2,1], index: 3, kind: input, shape index: {}]   ;;  %s641_s4 = inlined_call_operand.hbm [shape: f32[2,32], index: 4, kind: input, shape index: {}]   ;;  %s642_s5 = inlined_call_operand.vmem [shape: f32[4,32], index: 5, kind: input, shape index: {}]   ;;  %s643_s6 = inlined_call_operand.hbm [shape: f32[8,128], index: 6, kind: output, shape index: {}]  }
   0x1   :  { %12 = vsyncpa [#allocation7], 0  ;;  %s30_s23 = sshll.u32 %s638_s1, 4  ;;  %s31_s23 = int_to_ptr.hbm [resolvable:$true] %s30_s23 }
   0x2   :  { %13 = vsyncpa [#allocation5], 0  ;;  %s550_s24 = smov [#allocation6]   ;;  %s19_s28 = sshll.u32 %s637_s0, 4  ;;  %s20_s28 = int_to_ptr.hbm [resolvable:$true] %s19_s28 }
   0x3   :  { %s32_s25 = sshll.u32 %s550_s24, 4  ;;  %s551_s29 = smov [#allocation3]   ;;  %s33_s25 = int_to_ptr.vmem [resolvable:$true] %s32_s25 }
   0x4   :  { %35 = dma.hbm_to_vmem [thread:$0]  %s31_s23, 256, %s33_s25, [#allocation7]  }
   0x5   :  { %s21_s30 = sshll.u32 %s551_s29, 4  ;;  %s45_s9 = sshll.u32 %s641_s4, 4  ;;  %s22_s30 = int_to_ptr.vmem [resolvable:$true] %s21_s30  ;;  %s46_s9 = int_to_ptr.hbm [resolvable:$true] %s45_s9 }
   0x6   :  { %24 = dma.hbm_to_vmem [thread:$0]  %s20_s28, 256, %s22_s30, [#allocation4]  }
   0x7   :  { %s552_s1 = smov [#allocation8]  }
   0x8   :  { %s47_s10 = sshll.u32 %s552_s1, 4  ;;  %s48_s10 = int_to_ptr.vmem [resolvable:$true] %s47_s10 }
   0x9   :  { %50 = dma.hbm_to_vmem [thread:$0]  %s46_s9, 32, %s48_s10, [#allocation7]  }
   0xa   :  { %544 = dma.done.wait [#allocation4], 256  }
   0xb   :  { %545 = vsyncadd [#allocation4], 4294967040 }
   0xc   :  { %546 = dma.done.wait [#allocation7], 288  }
   0xd   :  { %547 = vsyncadd [#allocation7], 4294967008  ;;  %v167_v0 = vlaneseq  ;;  %v553_v3 = vmov 0.0   ;;  %v109_v7 = vld [vmem:[%s642_s5] sm:$0xf]  ;;  %vm111_vm1 = vcmask 257024  }
   0xe   :  { %v110_v8 = vmul.f32 %v109_v7, %v109_v7  ;;  %v126_v15 = vld [vmem:[%s639_s2] sm:$0x3]  ;;  %v554_v17 = vmov 0   ;;  %vm215_vm5 = vcmask 254976   ;;  %vm178_vm10 = vcmask 1041409   ;;  %s390_s24 = sshll.u32 %s643_s6, 4  ;;  %s391_s24 = int_to_ptr.hbm [resolvable:$true] %s390_s24 }
   0xf   :  { %v281_v1 = vshrl.u32 %v167_v0, 7  ;;  %v601_v2 = vand.u32 127, %v167_v0  ;;  %421 = vset.pattern.permute.xlu1 %v554_v17  ;;  %v128_v18 = vrot.slane %v126_v15, 1  ;;  %v129_v22 = vperm.slane %v126_v15, 0  ;;  %v169_v46 = vld [vmem:[%s640_s3] sm:$0x3] }
  0x10   :  { %v112_v10 = vsel %vm111_vm1, %v110_v8, 0.0  ;;  %v213_v50 = vld [vmem:[#allocation8] sm:$0x3]  ;;  %vm182_vm11 = vcmask 25600   ;;  %vm193_vm15 = vcmask 1024   ;;  %s556_s26 = smov [#allocation9]  }
  0x11   :  { %422 = vset.pattern.permute.xlu2 %v281_v1  ;;  %vm282_vm0 = vcmp.eq.s32.totalorder %v281_v1, %v601_v2  ;;  %428 = vset.pattern.permute.xlu0 %v281_v1  ;;  %v130_v21 = vperm.slane %v128_v18, 0  ;;  %v214_v51 = vmul.f32 %v213_v50, %v213_v50  ;;  %s388_s27 = sshll.u32 %s556_s26, 4  ;;  %s389_s27 = int_to_ptr.vmem [resolvable:$true] %s388_s27 }
  0x12   :  { %v401_v4 = vsel %vm282_vm0, 1.0, %v553_v3  ;;  %113 = vadd.xlane.f32.xlu0 %v112_v10  ;;  %vm347_vm0 = vcmask 1042434  }
  0x13   :  { %v286_v5 = vperm.slane %v401_v4, 0  ;;  %v293_v6 = vperm.slane %v401_v4, 1  ;;  %v300_v47 = vperm.slane %v401_v4, 2  ;;  %v307_v48 = vperm.slane %v401_v4, 3 }
  0x14   :  { %v216_v52 = vsel %vm215_vm5, %v214_v51, 0.0 }
  0x15   :  { %v423_v9 = vpack.i.bf16 %v293_v6, %v286_v5  ;;  %v429_v49 = vpack.i.bf16 %v307_v48, %v300_v47 }
  0x19   :  { %424 = vperm.xlu2 %422, %v423_v9  }
  0x21   :  { %434 = vset.pattern.permute.xlu2 %v554_v17 }
  0x73   :  { %v425_v53 = vpop.permute.xlu2 %424 }
  0x74   :  { %v426_v54 = vunpack.i.l.bf16 %v425_v53 }
  0x85   :  { %v114_v11 = vpop.xlane.xlu0 %113 }
  0x86   :  { %436 = vrsqrt.f32 %v114_v11  ;;  %vm121_vm3 = vweird.f32 %v114_v11 }
  0x8c   :  { %v437_v12 = vpop.eup %436 }
  0x8d   :  { %v116_v13 = vmul.f32 %v437_v12, %v114_v11  ;;  %vm122_vm2 = vweird.f32 %v437_v12 }
  0x8e   :  { %vm123_vm4 = vmor %vm121_vm3, %vm122_vm2  ;;  %vm352_vm2 = vcmask 27648  }
  0x8f   :  { %v117_v14 = vmul.f32 %v437_v12, %v116_v13 }
  0x91   :  { %v118_v16 = vmul.f32 0.5, %v117_v14 }
  0x93   :  { %v119_v19 = vsub.f32 1.5, %v118_v16 }
  0x95   :  { %v120_v20 = vmul.f32 %v437_v12, %v119_v19 }
  0x97   :  { %v124_v23 = vsel %vm123_vm4, %v437_v12, %v120_v20 }
  0x98   :  { %v125_v24 = vmul.f32 %v124_v23, %v109_v7 }
  0x9a   :  { %v256_v25 = vperm.slane %v125_v24, 0  ;;  %v134_v26 = vsub.f32 %v130_v21, %v125_v24  ;;  %v133_v27 = vsub.f32 %v129_v22, %v125_v24  ;;  %v253_v28 = vrot.slane %v125_v24, 1 }
  0x9b   :  { %v254_v29 = vrot.slane %v125_v24, 2  ;;  %v255_v40 = vrot.slane %v125_v24, 3 }
  0x9c   :  { %v264_v30 = vmul.f32 %v256_v25, %v125_v24  ;;  %v136_v31 = vmul.f32 %v134_v26, %v134_v26  ;;  %v135_v32 = vmul.f32 %v133_v27, %v133_v27  ;;  %v257_v36 = vperm.slane %v253_v28, 0 }
  0x9d   :  { %v258_v37 = vperm.slane %v254_v29, 0  ;;  %v259_v43 = vperm.slane %v255_v40, 0 }
  0x9e   :  { %v268_v33 = vsel %vm111_vm1, %v264_v30, 0.0  ;;  %v140_v34 = vsel %vm111_vm1, %v136_v31, 0.0  ;;  %v137_v35 = vsel %vm111_vm1, %v135_v32, 0.0  ;;  %v265_v38 = vmul.f32 %v257_v36, %v125_v24 }
  0x9f   :  { %269 = vadd.xlane.f32.xlu2 %v268_v33  ;;  %141 = vadd.xlane.f32.xlu1 %v140_v34  ;;  %v266_v39 = vmul.f32 %v258_v37, %v125_v24  ;;  %v267_v44 = vmul.f32 %v259_v43, %v125_v24  ;;  %v427_v32 = vunpack.i.h.bf16 %v425_v53  ;;  %v72_v53 = vld [vmem:[#allocation3 + $0x8] sm:$0xff] }
  0xa0   :  { %138 = vadd.xlane.f32.xlu0 %v137_v35  ;;  %v271_v41 = vsel %vm111_vm1, %v265_v38, 0.0 }
  0xa1   :  { %v274_v42 = vsel %vm111_vm1, %v266_v39, 0.0  ;;  %v277_v45 = vsel %vm111_vm1, %v267_v44, 0.0  ;;  %vm349_vm1 = vcmask 1043459  }
  0xa7   :  { %272 = vadd.xlane.f32.xlu2 %v271_v41 }
  0xa8   :  { %275 = vadd.xlane.f32.xlu0 %v274_v42 }
  0xb0   :  { %278 = vadd.xlane.f32.xlu0 %v277_v45 }
  0xb8   :  { %171 = vperm.xlu1 %421, %v169_v46  }
  0xc4   :  { %430 = vperm.xlu0 %428, %v429_v49  }
  0xcc   :  { %435 = vset.pattern.permute.xlu0 %v554_v17 }
  0xe2   :  { %217 = vadd.xlane.f32.xlu1 %v216_v52  ;;  %v71_v52 = vld [vmem:[#allocation3] sm:$0xff] }
 0x112   :  { %v270_v55 = vpop.xlane.xlu2 %269  ;;  %v142_v56 = vpop.xlane.xlu1 %141 }
 0x113   :  { %v318_v57 = vsub.f32 %v270_v55, %v426_v54  ;;  %438 = vrsqrt.f32 %v142_v56  ;;  %v139_v58 = vpop.xlane.xlu0 %138  ;;  %vm162_vm6 = vcmp.eq.f32.partialorder %v142_v56, inf  ;;  %v165_v12 = vand.u32 2147483648, %v142_v56  ;;  %v73_v54 = vld [vmem:[#allocation6] sm:$0xff]  ;;  %v74_v55 = vld [vmem:[#allocation6 + $0x8] sm:$0xff] }
 0x114   :  { %440 = vrsqrt.f32 %v139_v58  ;;  %vm150_vm7 = vcmp.eq.f32.partialorder %v139_v58, inf  ;;  %v153_v13 = vand.u32 2147483648, %v139_v58  ;;  %vm164_vm8 = vcmp.eq.f32.partialorder %v142_v56, 0.0 }
 0x115   :  { %v322_v59 = vmul.f32 %v318_v57, %v318_v57  ;;  %vm152_vm9 = vcmp.eq.f32.partialorder %v139_v58, 0.0  ;;  %v76_v57 = vsub.f32 %v72_v53, %v74_v55 }
 0x117   :  { %331 = vperm.xlu1 %421, %v322_v59   ;;  %v78_v59 = vmul.f32 %v76_v57, %v76_v57 }
 0x119   :  { %v439_v60 = vpop.eup %438 }
 0x11a   :  { %v441_v61 = vpop.eup %440  ;;  %v156_v62 = vmul.f32 %v439_v60, %v142_v56  ;;  %v273_v31 = vpop.xlane.xlu2 %272 }
 0x11b   :  { %v144_v63 = vmul.f32 %v441_v61, %v139_v58  ;;  %v276_v9 = vpop.xlane.xlu0 %275  ;;  %v319_v33 = vsub.f32 %v273_v31, %v427_v32 }
 0x11c   :  { %v157_v0 = vmul.f32 %v439_v60, %v156_v62 }
 0x11d   :  { %v145_v1 = vmul.f32 %v441_v61, %v144_v63  ;;  %v323_v34 = vmul.f32 %v319_v33, %v319_v33 }
 0x11e   :  { %v158_v3 = vmul.f32 0.5, %v157_v0 }
 0x11f   :  { %v146_v4 = vmul.f32 0.5, %v145_v1 }
 0x120   :  { %v159_v5 = vsub.f32 1.5, %v158_v3 }
 0x121   :  { %v147_v6 = vsub.f32 1.5, %v146_v4 }
 0x122   :  { %v160_v7 = vmul.f32 %v439_v60, %v159_v5 }
 0x123   :  { %v148_v8 = vmul.f32 %v441_v61, %v147_v6  ;;  %v279_v26 = vpop.xlane.xlu0 %278 }
 0x124   :  { %v161_v10 = vmul.f32 %v160_v7, %v142_v56 }
 0x125   :  { %v149_v11 = vmul.f32 %v148_v8, %v139_v58 }
 0x126   :  { %v163_v14 = vsel %vm162_vm6, %v142_v56, %v161_v10  ;;  %v75_v56 = vsub.f32 %v71_v52, %v73_v54 }
 0x127   :  { %v151_v15 = vsel %vm150_vm7, %v139_v58, %v149_v11  ;;  %v166_v16 = vsel %vm164_vm8, %v165_v12, %v163_v14 }
 0x128   :  { %v154_v17 = vsel %vm152_vm9, %v153_v13, %v151_v15  ;;  %v177_v18 = vperm.slane %v166_v16, %v601_v2  ;;  %v77_v58 = vmul.f32 %v75_v56, %v75_v56 }
 0x129   :  { %v176_v19 = vperm.slane %v154_v17, %v601_v2 }
 0x12a   :  { %v172_v20 = vpop.permute.xlu1 %171  ;;  %v90_v60 = vadd.f32 %v78_v59, %v77_v58 }
 0x12b   :  { %vm173_vm12 = vcmp.eq.s32.totalorder %v601_v2, %v172_v20  ;;  %v179_v21 = vsel %vm178_vm10, %v177_v18, %v176_v19 }
 0x12c   :  { %v186_v22 = vsel %vm173_vm12, 1e+30, %v179_v21  ;;  %v181_v23 = vsel %vm173_vm12, %v179_v21, 0.0 }
 0x12d   :  { %v187_v24 = vsel %vm182_vm11, %v186_v22, inf  ;;  %v183_v25 = vsel %vm182_vm11, %v181_v23, 0.0  ;;  %v555_v23 = vmov 2.0  }
 0x12e   :  { %188 = vmin.xlane.f32.xlu0 %v187_v24  ;;  %184 = vadd.xlane.f32.xlu2 %v183_v25 }
 0x136   :  { %v431_v27 = vpop.permute.xlu0 %430 }
 0x137   :  { %v432_v28 = vunpack.i.l.bf16 %v431_v27  ;;  %v433_v35 = vunpack.i.h.bf16 %v431_v27 }
 0x139   :  { %v320_v29 = vsub.f32 %v276_v9, %v432_v28  ;;  %v321_v36 = vsub.f32 %v279_v26, %v433_v35 }
 0x13b   :  { %v324_v30 = vmul.f32 %v320_v29, %v320_v29  ;;  %v325_v37 = vmul.f32 %v321_v36, %v321_v36 }
 0x13d   :  { %337 = vperm.xlu1 %421, %v324_v30  }
 0x146   :  { %334 = vperm.xlu2 %434, %v323_v34  }
 0x14e   :  { %340 = vperm.xlu2 %434, %v325_v37  }
 0x155   :  { %v218_v38 = vpop.xlane.xlu1 %217 }
 0x156   :  { %442 = vrsqrt.f32 %v218_v38  ;;  %vm226_vm13 = vcmp.eq.f32.partialorder %v218_v38, inf  ;;  %v229_v45 = vand.u32 2147483648, %v218_v38  ;;  %vm228_vm14 = vcmp.eq.f32.partialorder %v218_v38, 0.0 }
 0x157   :  { %444 = vrcp.f32 %v555_v23 }
 0x15c   :  { %v443_v39 = vpop.eup %442 }
 0x15d   :  { %v220_v40 = vmul.f32 %v443_v39, %v218_v38  ;;  %v445_v25 = vpop.eup %444 }
 0x15e   :  { %v205_v27 = vmul.f32 2.0, %v445_v25  ;;  %vm209_vm3 = vweird.f32 %v445_v25 }
 0x15f   :  { %v221_v41 = vmul.f32 %v443_v39, %v220_v40 }
 0x160   :  { %v206_v28 = vsub.f32 1.0, %v205_v27 }
 0x161   :  { %v222_v42 = vmul.f32 0.5, %v221_v41 }
 0x162   :  { %v207_v33 = vmul.f32 %v445_v25, %v206_v28 }
 0x163   :  { %v223_v43 = vsub.f32 1.5, %v222_v42 }
 0x164   :  { %v208_v37 = vadd.f32 %v445_v25, %v207_v33 }
 0x165   :  { %v224_v44 = vmul.f32 %v443_v39, %v223_v43 }
 0x166   :  { %v210_v41 = vsel %vm209_vm3, %v445_v25, %v208_v37 }
 0x167   :  { %v225_v46 = vmul.f32 %v224_v44, %v218_v38  ;;  %91 = vadd.xlane.f32.xlu1 %v90_v60 }
 0x169   :  { %v227_v47 = vsel %vm226_vm13, %v218_v38, %v225_v46 }
 0x16a   :  { %v230_v48 = vsel %vm228_vm14, %v229_v45, %v227_v47 }
 0x16b   :  { %v231_v49 = vsub.f32 1.0, %v230_v48 }
 0x16d   :  { %v232_v50 = vmax.f32 %v231_v49, 0.0 }
 0x16f   :  { %v233_v51 = vsel %vm193_vm15, %v232_v50, 0.0 }
 0x170   :  { %234 = vadd.xlane.f32.xlu0 %v233_v51 }
 0x189   :  { %v332_v3 = vpop.permute.xlu1 %331 }
 0x18a   :  { %v342_v8 = vperm.slane %v332_v3, %v601_v2 }
 0x1a1   :  { %v185_v61 = vpop.xlane.xlu2 %184  ;;  %v189_v63 = vpop.xlane.xlu0 %188 }
 0x1a2   :  { %v190_v62 = vadd.f32 0.1, %v185_v61 }
 0x1a4   :  { %v191_v0 = vsub.f32 %v190_v62, %v189_v63 }
 0x1a6   :  { %v192_v1 = vmax.f32 %v191_v0, 0.0 }
 0x1a8   :  { %v194_v4 = vsel %vm193_vm15, %v192_v1, 0.0 }
 0x1a9   :  { %v335_v5 = vpop.permute.xlu2 %334  ;;  %195 = vadd.xlane.f32.xlu2 %v194_v4 }
 0x1aa   :  { %v343_v6 = vperm.slane %v335_v5, %v601_v2 }
 0x1ac   :  { %v346_v11 = vsel %vm178_vm10, %v343_v6, %v342_v8 }
 0x1af   :  { %v338_v7 = vpop.permute.xlu1 %337 }
 0x1b0   :  { %v344_v9 = vperm.slane %v338_v7, %v601_v2 }
 0x1b1   :  { %v341_v10 = vpop.permute.xlu2 %340 }
 0x1b2   :  { %v345_v12 = vperm.slane %v341_v10, %v601_v2  ;;  %v348_v13 = vsel %vm347_vm0, %v344_v9, %v346_v11 }
 0x1b4   :  { %v350_v14 = vsel %vm349_vm1, %v345_v12, %v348_v13 }
 0x1b5   :  { %v353_v15 = vsel %vm352_vm2, %v350_v14, 0.0 }
 0x1b6   :  { %354 = vadd.xlane.f32.xlu0 %v353_v15 }
 0x1da   :  { %v92_v16 = vpop.xlane.xlu1 %91 }
 0x1db   :  { %v93_v17 = vrot.slane %v92_v16, 4 }
 0x1dd   :  { %v94_v18 = vadd.f32 %v93_v17, %v92_v16 }
 0x1df   :  { %v95_v19 = vrot.slane %v94_v18, 2 }
 0x1e1   :  { %v96_v20 = vadd.f32 %v95_v19, %v94_v18 }
 0x1e3   :  { %v97_v21 = vrot.slane %v96_v20, 1  ;;  %v235_v24 = vpop.xlane.xlu0 %234 }
 0x1e4   :  { %v236_v26 = vrot.slane %v235_v24, 4 }
 0x1e5   :  { %v98_v22 = vadd.f32 %v97_v21, %v96_v20 }
 0x1e6   :  { %v237_v2 = vadd.f32 %v236_v26, %v235_v24 }
 0x1e7   :  { %402 = vpush %v98_v22 }
 0x1e8   :  { %v238_v30 = vrot.slane %v237_v2, 2 }
 0x1ea   :  { %v239_v35 = vadd.f32 %v238_v30, %v237_v2 }
 0x1ec   :  { %v240_v39 = vrot.slane %v239_v35, 1 }
 0x1ee   :  { %v241_v43 = vadd.f32 %v240_v39, %v239_v35 }
 0x218   :  { %s631_s3 = spop %402 }
 0x219   :  { %s100_s20 = smul.f32 0.00048828125, %s631_s3 }
 0x21b   :  { %v101_v61 = vstv %s100_s20 }
 0x21c   :  { %v196_v29 = vpop.xlane.xlu2 %195 }
 0x21d   :  { %v197_v31 = vrot.slane %v196_v29, 4 }
 0x21f   :  { %v198_v32 = vadd.f32 %v197_v31, %v196_v29 }
 0x221   :  { %v199_v34 = vrot.slane %v198_v32, 2 }
 0x223   :  { %v200_v36 = vadd.f32 %v199_v34, %v198_v32 }
 0x225   :  { %v201_v38 = vrot.slane %v200_v36, 1 }
 0x227   :  { %v202_v40 = vadd.f32 %v201_v38, %v200_v36 }
 0x229   :  { %v355_v42 = vpop.xlane.xlu0 %354  ;;  %404 = vpush %v202_v40 }
 0x22a   :  { %v356_v44 = vrot.slane %v355_v42, 4  ;;  %406 = vpush %v210_v41 }
 0x22b   :  { %408 = vpush %v241_v43 }
 0x22c   :  { %v357_v45 = vadd.f32 %v356_v44, %v355_v42 }
 0x22e   :  { %v358_v46 = vrot.slane %v357_v45, 2 }
 0x230   :  { %v359_v47 = vadd.f32 %v358_v46, %v357_v45 }
 0x232   :  { %v360_v48 = vrot.slane %v359_v47, 1 }
 0x234   :  { %v361_v49 = vadd.f32 %v360_v48, %v359_v47 }
 0x236   :  { %410 = vpush %v361_v49 }
 0x25a   :  { %s405_s13 = spop %404 }
 0x25b   :  { %s407_s14 = spop %406 }
 0x25c   :  { %s212_s15 = smul.f32 %s407_s14, %s405_s13  ;;  %s409_s16 = spop %408 }
 0x25d   :  { %s251_s17 = smul.f32 %s409_s16, %s407_s14 }
 0x25f   :  { %s377_s18 = sadd.f32 %s251_s17, %s212_s15 }
 0x267   :  { %s411_s19 = spop %410 }
 0x268   :  { %v363_v50 = vstv %s411_s19 }
 0x269   :  { %446 = vrsqrt.f32 %v363_v50  ;;  %vm371_vm4 = vcmp.eq.f32.partialorder %v363_v50, inf  ;;  %v374_v58 = vand.u32 2147483648, %v363_v50  ;;  %vm373_vm5 = vcmp.eq.f32.partialorder %v363_v50, 0.0 }
 0x26f   :  { %v447_v51 = vpop.eup %446 }
 0x270   :  { %v365_v52 = vmul.f32 %v447_v51, %v363_v50 }
 0x272   :  { %v366_v53 = vmul.f32 %v447_v51, %v365_v52 }
 0x274   :  { %v367_v54 = vmul.f32 0.5, %v366_v53 }
 0x276   :  { %v368_v55 = vsub.f32 1.5, %v367_v54 }
 0x278   :  { %v369_v56 = vmul.f32 %v447_v51, %v368_v55 }
 0x27a   :  { %v370_v57 = vmul.f32 %v369_v56, %v363_v50 }
 0x27c   :  { %v372_v59 = vsel %vm371_vm4, %v363_v50, %v370_v57 }
 0x27d   :  { %v375_v60 = vsel %vm373_vm5, %v374_v58, %v372_v59 }
 0x27e   :  { %412 = vpush %v375_v60 }
 0x2af   :  { %s413_s21 = spop %412 }
 0x2b0   :  { %s378_s25 = sadd.f32 %s413_s21, %s377_s18 }
 0x2b2   :  { %v380_v62 = vstv %s378_s25 }
 0x2b3   :  { %v381_v63 = vadd.f32 %v380_v62, %v101_v61 }
 0x2b5   :  { %382 = vst [vmem:[#allocation9] sm:$0xff] %v381_v63 }
 0x2b6   :  { %393 = dma.vmem_to_hbm [thread:$0]  %s389_s27, 128, %s391_s24, [#allocation5]  }
 0x2b7   :  { %548 = dma.done.wait [#allocation5], 128  }
 0x2b8   :  { %549 = vsyncadd [#allocation5], 4294967168 }
 0x2b9   :  { %398 = vsyncpa [#allocation4], 1 }
 0x2ba   :  { %399 = vsyncpa [#allocation7], 1 }
 0x2bb   :  { %400 = vsyncpa [#allocation5], 1 }

</bundles_post_ra>
